<compile_context>
chip_gen: v7x
topology: tpu7x:2x2x1
jax: 0.10.0
libtpu: 0.0.40
codegen_flags: <defaults>
</compile_context>

<pallas_src>
import functools

import jax
import jax.numpy as jnp
import numpy as np
from jax.experimental import pallas as pl
from jax.experimental.pallas import tpu as pltpu


def _round_up(a, b):
    return ((a + b - 1) // b) * b


def sine_stack_kernel(x_ref, w_ref, b_ref, o_ref, *, num_layers):
    """One row-tile of the packed SineLayer (stack) forward.

    x_ref : (TN, P)   packed input tile                            (mxu dtype)
    w_ref : (L, P, P) block-diag weights, omega_0 folded in        (mxu dtype)
    b_ref : (L, 1, P) packed biases, omega_0 folded in             (f32)
    o_ref : (TN, P)   packed, lane-dense output tile               (f32)
    """
    h = x_ref[...]
    for l in range(num_layers):
        z = jnp.dot(h, w_ref[l], preferred_element_type=jnp.float32) + b_ref[l]
        s = jnp.sin(z)                        # EUP; omega_0 already folded in
        h = s if l == num_layers - 1 else s.astype(x_ref.dtype)
    o_ref[...] = h.astype(o_ref.dtype)


def _block_diag(w, pack):
    """[slot, slot] -> pack-way block-diagonal [pack*slot, pack*slot]."""
    eye = jnp.eye(pack, dtype=w.dtype)
    i, o = w.shape
    return jnp.einsum("pq,io->piqo", eye, w).reshape(pack * i, pack * o)


def pack_sine_layers(weights, biases, *, omega_0=30.0, mxu_dtype=jnp.float32):
    """One-time packing of SineLayer params into the TPU-friendly layout.

    weights: list of [in_l, out_l] (transposed vs. torch's [out, in]).
    biases : list of [out_l].
    Folds omega_0 into weights/biases and builds PACK-way block-diagonal
    weights so PACK = 128 // slot samples share one 128-lane row.
    """
    dims = [weights[0].shape[0]] + [w.shape[1] for w in weights]
    max_dim = max(dims)
    if max_dim <= 128:
        slot = 1 << (max_dim - 1).bit_length()        # next pow2 -> divides 128
        pack = 128 // slot
    else:
        slot = _round_up(max_dim, 128)
        pack = 1

    wl, bl = [], []
    for w, b in zip(weights, biases):
        i, o = w.shape
        w_f = jnp.pad(omega_0 * w, ((0, slot - i), (0, slot - o)))
        b_f = jnp.pad(omega_0 * jnp.reshape(b, (-1,)), (0, slot - o))
        wl.append(_block_diag(w_f, pack))
        bl.append(jnp.tile(b_f, pack)[None, :])
    w_p = jnp.stack(wl).astype(mxu_dtype)             # (L, P, P)
    b_p = jnp.stack(bl).astype(jnp.float32)           # (L, 1, P)

    meta = dict(pack=pack, slot=slot, in_features=dims[0],
                out_features=dims[-1], layers=len(weights))
    return w_p, b_p, meta


def sine_layer_forward(x, w_p, b_p, meta, *, tile_rows=512):
    """Packed SineLayer forward.  x: [N, IN] f32 -> [N, OUT] f32."""
    N, IN = x.shape
    pack, slot = meta["pack"], meta["slot"]
    OUT, L = meta["out_features"], meta["layers"]
    assert IN == meta["in_features"]
    P = pack * slot                       # packed lane width (multiple of 128)
    mxu_dtype = w_p.dtype

    n_rows = -(-N // pack)                                 # packed rows needed
    tile = min(int(tile_rows), _round_up(n_rows, 8))
    tile = max(8, _round_up(tile, 8))
    if n_rows >= 16 and _round_up(n_rows, tile) // tile < 2:
        # Keep >= 2 grid steps so both v7x TensorCores get work.
        tile = max(8, _round_up(-(-n_rows // 2), 8))
    n_rows_pad = _round_up(n_rows, tile)
    n_pad = n_rows_pad * pack

    x_p = jnp.pad(x, ((0, n_pad - N), (0, slot - IN)))
    x_p = x_p.reshape(n_rows_pad, P).astype(mxu_dtype)

    grid = (n_rows_pad // tile,)
    kernel = functools.partial(sine_stack_kernel, num_layers=L)

    itemsize = jnp.dtype(mxu_dtype).itemsize
    cost = pl.CostEstimate(
        flops=2 * n_rows_pad * P * P * L,
        transcendentals=n_rows_pad * P * L,
        bytes_accessed=(x_p.size * itemsize + n_rows_pad * P * 4
                        + w_p.size * itemsize + b_p.size * 4),
    )

    out_p = pl.pallas_call(
        kernel,
        out_shape=jax.ShapeDtypeStruct((n_rows_pad, P), jnp.float32),
        grid_spec=pltpu.PrefetchScalarGridSpec(
            num_scalar_prefetch=0,
            grid=grid,
            in_specs=[
                pl.BlockSpec((tile, P), lambda i: (i, 0)),     # packed x tile
                # Grid-invariant weights/bias (constant index_map) -> DMA'd
                # once and kept resident in VMEM across the whole grid.
                pl.BlockSpec((L, P, P), lambda i: (0, 0, 0)),
                pl.BlockSpec((L, 1, P), lambda i: (0, 0, 0)),
            ],
            out_specs=pl.BlockSpec((tile, P), lambda i: (i, 0)),
        ),
        compiler_params=pltpu.CompilerParams(
            dimension_semantics=("parallel",),
        ),
        cost_estimate=cost,
    )(x_p, w_p, b_p)

    # Layout plumbing only: un-pack the lane-dense slab back to [N, OUT].
    return out_p.reshape(n_pad, slot)[:N, :OUT]


def sine_layer_reference(x, w, b, omega_0=30.0):
    """Module-faithful reference: sin(omega_0 * (x @ W + b))."""
    return jnp.sin(omega_0 * (x @ w + b))


if __name__ == "__main__":
    omega_0 = 30.0
    N = 200                  # exercises row padding / slicing
    H = 32                   # SIREN-sized feature dim (lane-packed 4x)
    key = jax.random.PRNGKey(0)

    # ------------------------------------------------------------------
    # Config 1: a single hidden SineLayer (exactly the PyTorch module),
    # in = out = 32, is_first=False init bounds.
    # ------------------------------------------------------------------
    key, kx, kw, kb = jax.random.split(key, 4)
    x = jax.random.normal(kx, (N, H), jnp.float32)
    w_bound = np.sqrt(6.0 / H) / omega_0
    w = jax.random.uniform(kw, (H, H), jnp.float32, -w_bound, w_bound)   # [in,out]
    b = jax.random.uniform(kb, (H,), jnp.float32,
                           -1.0 / np.sqrt(H), 1.0 / np.sqrt(H))

    w_p, b_p, meta = pack_sine_layers([w], [b], omega_0=omega_0)
    out = jax.block_until_ready(sine_layer_forward(x, w_p, b_p, meta))

    # Tight check vs. the (exactly equivalent) omega-folded formulation.
    ref_folded = jnp.sin(x @ (omega_0 * w) + omega_0 * b)
    np.testing.assert_allclose(np.asarray(out), np.asarray(ref_folded),
                               rtol=1e-5, atol=1e-5)
    # Module-faithful check; looser because default-precision MXU truncates
    # (omega0*W) slightly differently than omega0*(truncated x@W).
    ref = sine_layer_reference(x, w, b, omega_0)
    np.testing.assert_allclose(np.asarray(out), np.asarray(ref),
                               rtol=0.0, atol=2e-2)

    # bf16 MXU-operand path (v6e/v7x): f32 accumulation, bias add, sin.
    w_p16, b_p16, meta16 = pack_sine_layers([w], [b], omega_0=omega_0,
                                            mxu_dtype=jnp.bfloat16)
    out16 = jax.block_until_ready(sine_layer_forward(x, w_p16, b_p16, meta16))
    np.testing.assert_allclose(np.asarray(out16), np.asarray(ref),
                               rtol=0.0, atol=7e-2)

    # ------------------------------------------------------------------
    # Config 2: non-square SineLayer, in = 32 -> out = 64 (exercises the
    # rectangular padding path; slot = 64, pack = 2).
    # ------------------------------------------------------------------
    key, kw2, kb2 = jax.random.split(key, 3)
    O2 = 64
    w2 = jax.random.uniform(kw2, (H, O2), jnp.float32, -w_bound, w_bound)
    b2 = jax.random.uniform(kb2, (O2,), jnp.float32,
                            -1.0 / np.sqrt(H), 1.0 / np.sqrt(H))
    w2_p, b2_p, meta2 = pack_sine_layers([w2], [b2], omega_0=omega_0)
    out2 = jax.block_until_ready(sine_layer_forward(x, w2_p, b2_p, meta2))
    ref2_folded = jnp.sin(x @ (omega_0 * w2) + omega_0 * b2)
    np.testing.assert_allclose(np.asarray(out2), np.asarray(ref2_folded),
                               rtol=1e-4, atol=1e-4)
    np.testing.assert_allclose(np.asarray(out2),
                               np.asarray(sine_layer_reference(x, w2, b2, omega_0)),
                               rtol=0.0, atol=2e-2)

    # ------------------------------------------------------------------
    # Config 3: fused stack of 3 SineLayers (how the source model chains
    # them) — same kernel, L = 3, weights resident across the grid.
    # ------------------------------------------------------------------
    ws, bs = [], []
    kk = key
    for l in range(3):
        kk, kw3, kb3 = jax.random.split(kk, 3)
        bnd = (1.0 / H) if l == 0 else (np.sqrt(6.0 / H) / omega_0)
        ws.append(jax.random.uniform(kw3, (H, H), jnp.float32, -bnd, bnd))
        bs.append(jax.random.uniform(kb3, (H,), jnp.float32,
                                     -1.0 / np.sqrt(H), 1.0 / np.sqrt(H)))
    w3_p, b3_p, meta3 = pack_sine_layers(ws, bs, omega_0=omega_0)
    out3 = jax.block_until_ready(sine_layer_forward(x, w3_p, b3_p, meta3))
    h_ref = x
    for w_l, b_l in zip(ws, bs):
        h_ref = sine_layer_reference(h_ref, w_l, b_l, omega_0)
    np.testing.assert_allclose(np.asarray(out3), np.asarray(h_ref),
                               rtol=0.0, atol=2e-2)

    print("KERNEL_OK")
</pallas_src>

<mosaic_0001>
module attributes {stable_mosaic.version = 11 : i64} {
  func.func @sine_stack_kernel(%arg0: i32, %arg1: memref<32x128xf32, #tpu.memory_space<vmem>>, %arg2: memref<1x128x128xf32, #tpu.memory_space<vmem>>, %arg3: memref<1x1x128xf32, #tpu.memory_space<vmem>>, %arg4: memref<32x128xf32, #tpu.memory_space<vmem>>) attributes {dimension_semantics = [#tpu.dimension_semantics<parallel>], iteration_bounds = array<i64: 2>, scalar_prefetch = 0 : i64, scratch_operands = 0 : i64, tpu.core_type = #tpu.core_type<tc>, window_params = [{transform_indices = @transform_0, window_bounds = array<i64: 32, 128>}, {pipeline_mode = #tpu.pipeline_mode<synchronous>, transform_indices = @transform_1, window_bounds = array<i64: 1, 128, 128>}, {pipeline_mode = #tpu.pipeline_mode<synchronous>, transform_indices = @transform_2, window_bounds = array<i64: 1, 1, 128>}, {transform_indices = @transform_3, window_bounds = array<i64: 32, 128>}]} {
    %c0 = arith.constant 0 : index
    %c0_0 = arith.constant 0 : index
    %0 = vector.load %arg1[%c0, %c0_0] : memref<32x128xf32, #tpu.memory_space<vmem>>, vector<32x128xf32>
    %c0_1 = arith.constant 0 : index
    %c0_2 = arith.constant 0 : index
    %c0_3 = arith.constant 0 : index
    %1 = vector.load %arg2[%c0_1, %c0_2, %c0_3] : memref<1x128x128xf32, #tpu.memory_space<vmem>>, vector<1x128x128xf32>
    %2 = vector.shape_cast %1 : vector<1x128x128xf32> to vector<128x128xf32>
    %cst = arith.constant dense<0.000000e+00> : vector<32x128xf32>
    %3 = tpu.matmul %0, %2, %cst {dimension_numbers = #tpu.dot_dimension_numbers<[1], [0], [0], [1], [0, 0, 1, 1], [], []>} : vector<32x128xf32>, vector<128x128xf32>, vector<32x128xf32> -> vector<32x128xf32>
    %c0_4 = arith.constant 0 : index
    %c0_5 = arith.constant 0 : index
    %c0_6 = arith.constant 0 : index
    %4 = vector.load %arg3[%c0_4, %c0_5, %c0_6] : memref<1x1x128xf32, #tpu.memory_space<vmem>>, vector<1x1x128xf32>
    %5 = vector.shape_cast %4 : vector<1x1x128xf32> to vector<1x128xf32>
    %6 = vector.broadcast %5 : vector<1x128xf32> to vector<32x128xf32>
    %7 = arith.addf %3, %6 : vector<32x128xf32>
    %8 = math.sin %7 : vector<32x128xf32>
    %c0_7 = arith.constant 0 : index
    %c0_8 = arith.constant 0 : index
    %9 = vector.load %arg4[%c0_7, %c0_8] : memref<32x128xf32, #tpu.memory_space<vmem>>, vector<32x128xf32>
    tpu.vector_store %arg4[%c0_7, %c0_8], %8 {strides = array<i32>} : memref<32x128xf32, #tpu.memory_space<vmem>>, vector<32x128xf32>,
    return
  }
  func.func @transform_0(%arg0: i32) -> (i32, i32) {
    %c0_i32 = arith.constant 0 : i32
    %c0_i32_0 = arith.constant 0 : i32
    return %arg0, %c0_i32 : i32, i32
  }
  func.func @transform_1(%arg0: i32) -> (i32, i32, i32) {
    %c0_i32 = arith.constant 0 : i32
    %c0_i32_0 = arith.constant 0 : i32
    %c0_i32_1 = arith.constant 0 : i32
    %c0_i32_2 = arith.constant 0 : i32
    return %c0_i32, %c0_i32_0, %c0_i32_1 : i32, i32, i32
  }
  func.func @transform_2(%arg0: i32) -> (i32, i32, i32) {
    %c0_i32 = arith.constant 0 : i32
    %c0_i32_0 = arith.constant 0 : i32
    %c0_i32_1 = arith.constant 0 : i32
    %c0_i32_2 = arith.constant 0 : i32
    return %c0_i32, %c0_i32_0, %c0_i32_1 : i32, i32, i32
  }
  func.func @transform_3(%arg0: i32) -> (i32, i32) {
    %c0_i32 = arith.constant 0 : i32
    %c0_i32_0 = arith.constant 0 : i32
    return %arg0, %c0_i32 : i32, i32
  }
}

</mosaic_0001>

<bundles_post_ra>
// kernel: tpu_custom_call.1
= control target key start
LH: loop header
LB: loop body
LE: loop exit
PB: predicated region body
PF: predicated region fallthrough
CT: control target
= control target key end

     0   :  { %8 = vsyncpa [#allocation3], 0  ;;  %s1761_s0 = inlined_call_operand.hbm [shape: f32[64,128], index: 0, kind: input, shape index: {}]   ;;  %s1762_s1 = inlined_call_operand.hbm [shape: f32[1,128,128], index: 1, kind: input, shape index: {}]   ;;  %s1763_s2 = inlined_call_operand.vmem [shape: f32[1,1,128], index: 2, kind: input, shape index: {}]   ;;  %s1764_s3 = inlined_call_operand.hbm [shape: f32[64,128], index: 3, kind: output, shape index: {}]  }
   0x1   :  { %10 = vsyncpa [#allocation3 + $0x1], 0 }
   0x2   :  { %11 = vsyncpa [#allocation6], 0 }
   0x3   :  { %12 = vsyncpa [#allocation4], 0 }
   0x4   :  { %14 = vsyncpa [#allocation4 + $0x1], 0  ;;  %s1238_s12 = smov 0   ;;  %s1240_s13 = smov 0  }
   0x5   :  { %s1242_s14 = smov 0   ;;  %s1244_s15 = smov 0  }
   0x6 LB: > { %s1259_s16 = sadd.s32 4294967295, %s1203_s15   ;;  %s835_s17 = sadd.s32 4294967294, %s1203_s15   ;;  %s1203_s15 = sphi %s1244_s15, %s1788_s15   ;;  %s1199_s14 = sphi %s1242_s14, %s1787_s14   ;;  %s1195_s13 = sphi %s1240_s13, %s1786_s13   ;;  %s1191_s12 = sphi %s1238_s12, %s1785_s12  }
   0x7   : > { %p40_p0 = scmp.ne.s32.totalorder %s1195_s13, %s1191_s12  ;;  %p1765_p1 = scmp.eq.s32.totalorder %s1259_s16, 0 }
   0x8   : > { %p112_p3 = scmp.eq.s32.totalorder %s835_s17, 1  ;;  %p836_p5 = scmp.ge.s32.totalorder %s1203_s15, 1 }
   0x9   : > { %p1268_p4 = por %p1765_p1, %p40_p0  ;;  %p119_p7 = scmp.lt.s32.totalorder %s1203_s15, 3 }
   0xa   : > { %p1273_p6 = por %p112_p3, %p40_p0  ;;  %s1205_s21 = smov [#allocation5]  }
   0xb   : > { %s1768_s18 = scalar_select %p1268_p4, 1, 0 }
   0xc   : > { %s1769_s19 = scalar_select %p1273_p6, 1, 0 }
   0xd   : > { %p1278_p8 = pnand %p836_p5, %p119_p7  ;;  %s131_s22 = sshll.u32 %s1205_s21, 4  ;;  %s1282_s22 = int_to_ptr.vmem [resolvable:$true] %s131_s22 }
   0xe   : > { %s1294_s24 = sadd.s32 1, %s1203_s15   ;;  %s27_s25 = sadd.s32 1, %s1199_s14 }
   0xf   : > { %s1770_s20 = scalar_select %p1278_p8, 1, 0 }
  0x10   : > { %p1000_p9 = pneg %p1278_p8  ;;  %s24_s26 = ssub.s32 %s1203_s15, %s1294_s24 }
  0x11   : > { %s1075_s29 = scalar_lea.hbm %s1762_s1, 2048 }
  0x12   : > { %p1289_p11 = pnand %p1000_p9, %p1765_p1  ;;  %p1076_p12 = scmp.ne.s32.totalorder %s1762_s1, %s1075_s29 }
  0x13   : > { %p1082_p5 = scmp.lt.u32.totalorder %s1075_s29, %s1762_s1 }
  0x14   : > { %p1077_p13 = pneg %p1289_p11 }
  0x16   : > { %p1078_p0 = pnand %p1077_p13, %p1076_p12 }
  0x18   : > { %p1079_p3 = pneg %p1078_p0 }
  0x1a   : > { %p1084_p7 = pnand %p1082_p5, %p1079_p3 }
  0x1c   : > { %1087 = shalt.err (!%p1084_p7)
}
  0x1d   : > { %s1088_s7 = scalar_lea.vmem %s1282_s22, 2048  ;;  %p1096_p2 = scmp.lt.s32.totalorder %s1282_s22, %s1282_s22 }
  0x1e   : > { %p1089_p9 = scmp.ne.s32.totalorder %s1282_s22, %s1088_s7  ;;  %p1097_p6 = scmp.lt.s32.totalorder %s1088_s7, %s1088_s7 }
  0x20   : > { %p1091_p10 = pnand %p1089_p9, %p1077_p13  ;;  %p1098_p4 = por %p1097_p6, %p1096_p2 }
  0x22   : > { %p1092_p1 = pneg %p1091_p10 }
  0x24   : > { %p1099_p8 = pnand %p1098_p4, %p1092_p1 }
  0x26   : > { %1102 = shalt.err (!%p1099_p8)
}
  0x27   : > { %s1206_s8 = smov 128   ;;  %s1207_s9 = smov 8  }
  0x28   : > { %1003 = dma.hbm_to_vmem [thread:$0]  (!%p1289_p11), %s1762_s1, 2048, %s1282_s22, [#allocation6], %s1206_s8, %s1206_s8, %s1207_s9  }
  0x29   : > { %p25_p1 = scmp.eq.s32.totalorder %s24_s26, 0  ;;  %p34_p2 = scmp.ne.s32.totalorder %s1199_s14, %s1195_s13 }
  0x2a   : > { %p35_p4 = scmp.eq.s32.totalorder %s1203_s15, 0  ;;  %p1013_p6 = scmp.lt.s32.totalorder %s1203_s15, 2 }
  0x2b   : > { %s1328_s17 = scalar_select %p25_p1, %s1199_s14, %s27_s25  }
  0x2c   : > { %p36_p8 = por %p35_p4, %p34_p2  ;;  %p1772_p10 = scmp.eq.s32.totalorder %s1259_s16, 1 }
  0x2d   : > { %s148_s23 = sand.u32 1, %s1199_s14   ;;  %s868_s27 = sshll.u32 %s1203_s15, 9 }
  0x2e   : > { %p1332_p12 = por %p1772_p10, %p34_p2  ;;  %s839_s28 = sshll.u32 %s148_s23, 5 }
  0x2f   : > { %s1341_s4 = scalar_lea.hbm %s1761_s0, %s868_s27  ;;  %s152_s22 = scalar_lea.vmem [#allocation2], %s839_s28 }
  0x30   : > { %s159_s25 = sshll.u32 %s152_s22, 4  ;;  %p1343_p11 = pnand %p1013_p6, %p36_p8  ;;  %s1347_s25 = int_to_ptr.vmem [resolvable:$true] %s159_s25 }
  0x31   : > { %s1349_s5 = scalar_lea.sflag [#allocation3], %s148_s23  ;;  %s1103_s6 = scalar_lea.hbm %s1341_s4, 512 }
  0x32   : > { %p1104_p13 = scmp.ne.s32.totalorder %s1341_s4, %s1103_s6  ;;  %p1105_p0 = pneg %p1343_p11 }
  0x33   : > { %s1108_s11 = scalar_lea.hbm %s1761_s0, 1024  ;;  %p1109_p7 = scmp.lt.u32.totalorder %s1341_s4, %s1761_s0 }
  0x34   : > { %p1106_p3 = pnand %p1105_p0, %p1104_p13  ;;  %p1110_p9 = scmp.lt.u32.totalorder %s1108_s11, %s1103_s6 }
  0x35   : > { %p1112_p2 = scmp.lt.u32.totalorder %s1103_s6, %s1341_s4 }
  0x36   : > { %p1107_p5 = pneg %p1106_p3  ;;  %p1111_p1 = por %p1110_p9, %p1109_p7 }
  0x38   : > { %p1113_p4 = por %p1112_p2, %p1111_p1 }
  0x3a   : > { %p1114_p6 = pnand %p1113_p4, %p1107_p5 }
  0x3c   : > { %1117 = shalt.err (!%p1114_p6)
}
  0x3d   : > { %s1118_s23 = scalar_lea.vmem %s1347_s25, 512  ;;  %s1208_s29 = smov [#allocation2]  }
  0x3e   : > { %p1119_p8 = scmp.ne.s32.totalorder %s1347_s25, %s1118_s23  ;;  %s1123_s30 = sshll.u32 %s1208_s29, 4  ;;  %s1124_s30 = int_to_ptr.vmem [resolvable:$false] %s1123_s30 }
  0x3f   : > { %s1125_s22 = scalar_lea.vmem %s1124_s30, 1024  ;;  %p1126_p3 = scmp.lt.s32.totalorder %s1347_s25, %s1124_s30 }
  0x40   : > { %p1121_p10 = pnand %p1119_p8, %p1105_p0  ;;  %p1127_p7 = scmp.lt.s32.totalorder %s1125_s22, %s1118_s23 }
  0x42   : > { %p1122_p13 = pneg %p1121_p10  ;;  %p1128_p9 = por %p1127_p7, %p1126_p3 }
  0x44   : > { %p1129_p1 = pnand %p1128_p9, %p1122_p13 }
  0x46   : > { %1132 = shalt.err (!%p1129_p1)
}
  0x47   : > { %1007 = dma.hbm_to_vmem [thread:$0]  (!%p1343_p11), %s1341_s4, 512, %s1347_s25, %s1349_s5, %s1206_s8, %s1206_s8, %s1207_s9  }
  0x48   : > { %p1775_p0 = scmp.ne.s32.totalorder %s1770_s20, 0 }
  0x49   : > { %s1383_s6 = sand.u32 (!%p1775_p0), 1, %s1195_s13   ;;  %p1776_p5 = scmp.ne.s32.totalorder (!%p1775_p0), %s1768_s18, 0 }
  0x4a   : > { %171 = sbr.rel (%p1775_p0) target bundleno = 483 (0x1e3), region = 32  ;;  %s843_s7 = sshll.u32 (!%p1775_p0), %s1383_s6, 5 }
  0x4b   : > { %s174_s10 = scalar_lea.sflag (!%p1775_p0), [#allocation3], %s1383_s6  ;;  %s1389_s26 = scalar_lea.vmem (!%p1775_p0), [#allocation2], %s843_s7 }
  0x51   : > { %1178 = dma.done.wait (%p1776_p5), %s174_s10, 512  }
  0x52   : > { %1180 = vsyncadd (%p1776_p5), %s174_s10, 4294966784  ;;  %p1777_p11 = scmp.eq.s32.totalorder %s1259_s16, 0 }
  0x54   : > { %1182 = dma.done.wait (%p1777_p11), [#allocation6], 2048   ;;  %p1778_p2 = pmov %p1777_p11 }
  0x55   : > { %v210_v0 = vld [vmem:[#allocation5] sm:$0xff]  ;;  %v211_v1 = vld [vmem:[#allocation5 + $0x8] sm:$0xff]  ;;  %v212_v2 = vld [vmem:[#allocation5 + $0x10] sm:$0xff]  ;;  %s1685_s8 = scalar_lea.vmem [#allocation7], %s843_s7  ;;  %s869_s9 = sshll.u32 %s1259_s16, 9 }
  0x56   : > { %1184 = vsyncadd (%p1778_p2), [#allocation6], 4294965248  ;;  %v928_v3 = vpack.c.bf16 %v211_v1, %v210_v0  ;;  %v213_v4 = vld [vmem:[#allocation5 + $0x18] sm:$0xff]  ;;  %v214_v6 = vld [vmem:[#allocation5 + $0x20] sm:$0xff]  ;;  %v1209_v0 = vmov 683565275   ;;  %s1713_s11 = scalar_lea.hbm %s1764_s3, %s869_s9 }
  0x57   : > { %v932_v5 = vpack.c.bf16 %v213_v4, %v212_v2  ;;  %v215_v7 = vld [vmem:[#allocation5 + $0x28] sm:$0xff]  ;;  %v206_v9 = vld [vmem:[%s1389_s26] sm:$0xff]  ;;  %v208_v10 = vld [vmem:[%s1389_s26 + $0x10] sm:$0xff]  ;;  %v1210_v4 = vmov 2475754826   ;;  %s752_s4 = sshll.u32 %s1685_s8, 4  ;;  %s1715_s4 = int_to_ptr.vmem [resolvable:$true] %s752_s4 }
  0x58   : > { %929 = vmatprep.subr.bf16.mxu0 %v928_v3  ;;  %960 = vmatprep.subr.bf16.mxu1 %v928_v3  ;;  %v936_v8 = vpack.c.bf16 %v215_v7, %v214_v6  ;;  %v216_v11 = vld [vmem:[#allocation5 + $0x30] sm:$0xff]  ;;  %v217_v12 = vld [vmem:[#allocation5 + $0x38] sm:$0xff]  ;;  %v218_v14 = vld [vmem:[#allocation5 + $0x40] sm:$0xff]  ;;  %v1211_v6 = vmov 2131351028   ;;  %s739_s16 = scalar_lea.sflag [#allocation4], %s1383_s6 }
  0x59   : > { %931 = vmatpush3.bf16.msra.mxu0 %v928_v3  ;;  %968 = vmatpush3.bf16.msra.mxu1 %v928_v3  ;;  %v940_v13 = vpack.c.bf16 %v217_v12, %v216_v11  ;;  %v219_v15 = vld [vmem:[#allocation5 + $0x48] sm:$0xff]  ;;  %v220_v17 = vld [vmem:[#allocation5 + $0x50] sm:$0xff]  ;;  %v221_v18 = vld [vmem:[#allocation5 + $0x58] sm:$0xff]  ;;  %s1133_s27 = scalar_lea.vmem %s1715_s4, 512  ;;  %s1215_s28 = smov [#allocation7]  }
  0x5a   : > { %933 = vmatprep.subr.bf16.mxu0 %v932_v5  ;;  %961 = vmatprep.subr.bf16.mxu1 %v932_v5  ;;  %v944_v16 = vpack.c.bf16 %v219_v15, %v218_v14  ;;  %v948_v19 = vpack.c.bf16 %v221_v18, %v220_v17  ;;  %v222_v20 = vld [vmem:[#allocation5 + $0x60] sm:$0xff]  ;;  %v223_v21 = vld [vmem:[#allocation5 + $0x68] sm:$0xff]  ;;  %v224_v23 = vld [vmem:[#allocation5 + $0x70] sm:$0xff]  ;;  %v1214_v17 = vmov 1326507024   ;;  %p1134_p4 = scmp.ne.s32.totalorder %s1715_s4, %s1133_s27  ;;  %s1137_s23 = sshll.u32 %s1215_s28, 4  ;;  %s1138_s23 = int_to_ptr.vmem [resolvable:$false] %s1137_s23 }
  0x5b   : > { %922 = vmatprep.mubr.f32.mxu0 %v206_v9  ;;  %925 = vmatprep.mubr.f32.mxu1 %v208_v10  ;;  %v952_v22 = vpack.c.bf16 %v223_v21, %v222_v20  ;;  %v225_v24 = vld [vmem:[#allocation5 + $0x78] sm:$0xff]  ;;  %v207_v26 = vld [vmem:[%s1389_s26 + $0x8] sm:$0xff]  ;;  %v846_v28 = vld [vmem:[%s1763_s2] ss:$0 sm:$0xff]  ;;  %v1213_v10 = vmov 920167782   ;;  %p1140_p10 = scmp.lt.s32.totalorder %s1715_s4, %s1138_s23 }
  0x5c   : > { %v956_v25 = vpack.c.bf16 %v225_v24, %v224_v23  ;;  %v209_v27 = vld [vmem:[%s1389_s26 + $0x18] sm:$0xff]  ;;  %p1135_p6 = pnand %p1134_p4, %p1332_p12  ;;  %s1139_s29 = scalar_lea.vmem %s1138_s23, 1024 }
  0x5d   : > { %935 = vmatpush3.bf16.msra.mxu0 %v932_v5  ;;  %969 = vmatpush3.bf16.msra.mxu1 %v932_v5  ;;  %p1141_p13 = scmp.lt.s32.totalorder %s1139_s29, %s1133_s27 }
  0x5e   : > { %937 = vmatprep.subr.bf16.mxu0 %v936_v8  ;;  %962 = vmatprep.subr.bf16.mxu1 %v936_v8  ;;  %p1136_p8 = pneg %p1135_p6 }
  0x5f   : > { %p1142_p3 = por %p1141_p13, %p1140_p10 }
  0x61   : > { %939 = vmatpush3.bf16.msra.mxu0 %v936_v8  ;;  %970 = vmatpush3.bf16.msra.mxu1 %v936_v8  ;;  %v1212_v8 = vmov 2102212464   ;;  %p1143_p7 = pnand %p1142_p3, %p1136_p8 }
  0x62   : > { %941 = vmatprep.subr.bf16.mxu0 %v940_v13  ;;  %963 = vmatprep.subr.bf16.mxu1 %v940_v13 }
  0x65   : > { %943 = vmatpush3.bf16.msra.mxu0 %v940_v13  ;;  %971 = vmatpush3.bf16.msra.mxu1 %v940_v13 }
  0x66   : > { %945 = vmatprep.subr.bf16.mxu0 %v944_v16  ;;  %964 = vmatprep.subr.bf16.mxu1 %v944_v16 }
  0x69   : > { %947 = vmatpush3.bf16.msra.mxu0 %v944_v16  ;;  %972 = vmatpush3.bf16.msra.mxu1 %v944_v16 }
  0x6a   : > { %949 = vmatprep.subr.bf16.mxu0 %v948_v19  ;;  %965 = vmatprep.subr.bf16.mxu1 %v948_v19 }
  0x6d   : > { %951 = vmatpush3.bf16.msra.mxu0 %v948_v19  ;;  %973 = vmatpush3.bf16.msra.mxu1 %v948_v19 }
  0x6e   : > { %953 = vmatprep.subr.bf16.mxu0 %v952_v22  ;;  %966 = vmatprep.subr.bf16.mxu1 %v952_v22 }
  0x71   : > { %955 = vmatpush3.bf16.msra.mxu0 %v952_v22  ;;  %974 = vmatpush3.bf16.msra.mxu1 %v952_v22 }
  0x72   : > { %957 = vmatprep.subr.bf16.mxu0 %v956_v25  ;;  %967 = vmatprep.subr.bf16.mxu1 %v956_v25 }
  0x75   : > { %959 = vmatpush3.bf16.msra.mxu0 %v956_v25  ;;  %975 = vmatpush3.bf16.msra.mxu1 %v956_v25 }
  0x78   : > { %923 = vmatmul.mubr.f32.vlgmr.msra.gmra.mrb[0].mxu0 %v207_v26  ;;  %926 = vmatmul.mubr.f32.vlgmr.msra.gmra.mrb[0].mxu1 %v209_v27 }
 0x14b   : > { %v924_v29 = vpop.f32.mrb[0].mxu0  ;;  %v927_v30 = vpop.f32.mrb[0].mxu1 }
 0x14c   : > { %v1406_v31 = vadd.f32 %v924_v29, %v846_v28  ;;  %v1408_v32 = vadd.f32 %v927_v30, %v846_v28  ;;  %v299_v33 = vpop.f32.mrb[1].mxu0  ;;  %v309_v34 = vpop.f32.mrb[1].mxu1 }
 0x14d   : > { %v1410_v35 = vadd.f32 %v846_v28, %v299_v33  ;;  %v1422_v58 = vadd.f32 %v846_v28, %v309_v34 }
 0x14e   : > { %v422_v36 = vand.u32 2147483647, %v1406_v31  ;;  %v425_v37 = vand.u32 2139095040, %v1406_v31  ;;  %v630_v38 = vand.u32 2147483647, %v1408_v32  ;;  %v633_v39 = vand.u32 2139095040, %v1408_v32 }
 0x14f   : > { %v321_v44 = vand.u32 2139095040, %v1410_v35  ;;  %v318_v52 = vand.u32 2147483647, %v1410_v35  ;;  %vm424_vm13 = vcmp.lt.s32.totalorder %v1406_v31, 0 }
 0x150   : > { %v426_v40 = vshrl.u32 %v425_v37, 23  ;;  %v429_v41 = vand.u32 8388607, %v422_v36  ;;  %v634_v42 = vshrl.u32 %v633_v39, 23  ;;  %v637_v43 = vand.u32 8388607, %v630_v38 }
 0x151   : > { %v322_v47 = vshrl.u32 %v321_v44, 23  ;;  %v1430_v61 = vand.u32 8388607, %v318_v52  ;;  %vm1535_vm14 = vcmp.le.f32.partialorder %v422_v36, 0.7853982 }
 0x152   : > { %v851_v45 = vadd.s32 4294967169, %v426_v40  ;;  %v859_v46 = vadd.s32 4294967169, %v634_v42  ;;  %v430_v48 = vor.u32 8388608, %v429_v41  ;;  %v638_v50 = vor.u32 8388608, %v637_v43 }
 0x153   : > { %v847_v53 = vadd.s32 4294967169, %v322_v47 }
 0x154   : > { %v432_v49 = vadd.s32 1, %v851_v45  ;;  %v640_v51 = vadd.s32 1, %v859_v46  ;;  %v1424_v59 = vshll.u32 %v430_v48, 8  ;;  %v1426_v60 = vshll.u32 %v638_v50, 8 }
 0x155   : > { %v1432_v62 = vadd.s32 1, %v847_v53 }
 0x156   : > { %vm433_vm0 = vcmp.gt.s32.totalorder %v432_v49, 0  ;;  %vm641_vm1 = vcmp.gt.s32.totalorder %v640_v51, 0 }
 0x157   : > { %v434_v54 = vsel %vm433_vm0, %v432_v49, 0  ;;  %v642_v57 = vsel %vm641_vm1, %v640_v51, 0  ;;  %vm329_vm6 = vcmp.gt.s32.totalorder %v1432_v62, 0 }
 0x158   : > { %v435_v55 = vshrl.u32 %v434_v54, 5  ;;  %v436_v56 = vand.u32 31, %v434_v54  ;;  %v1435_v2 = vshrl.u32 %v642_v57, 5  ;;  %v644_v3 = vand.u32 31, %v642_v57 }
 0x15a   : > { %v437_v63 = vsub.s32 32, %v436_v56  ;;  %v439_v1 = vshll.u32 %v1209_v0, %v436_v56  ;;  %v442_v5 = vshll.u32 %v1210_v4, %v436_v56  ;;  %v445_v7 = vshll.u32 %v1211_v6, %v436_v56 }
 0x15b   : > { %v448_v9 = vshll.u32 %v1212_v8, %v436_v56  ;;  %v451_v11 = vshll.u32 %v1213_v10, %v436_v56  ;;  %vm454_vm2 = vcmp.lt.s32.totalorder %v435_v55, 1  ;;  %vm455_vm3 = vcmp.lt.s32.totalorder %v435_v55, 2 }
 0x15c   : > { %v440_v12 = vshrl.u32 %v1210_v4, %v437_v63  ;;  %v443_v13 = vshrl.u32 %v1211_v6, %v437_v63  ;;  %v446_v14 = vshrl.u32 %v1212_v8, %v437_v63  ;;  %v438_v15 = vshrl.u32 %v1209_v0, %v437_v63 }
 0x15d   : > { %v449_v16 = vshrl.u32 %v1213_v10, %v437_v63  ;;  %v452_v18 = vshrl.u32 %v1214_v17, %v437_v63  ;;  %v645_v22 = vsub.s32 32, %v644_v3  ;;  %vm456_vm4 = vcmp.lt.s32.totalorder %v435_v55, 3 }
 0x15e   : > { %v441_v19 = vor.u32 %v440_v12, %v439_v1  ;;  %v444_v20 = vor.u32 %v443_v13, %v442_v5  ;;  %v447_v21 = vor.u32 %v446_v14, %v445_v7  ;;  %vm457_vm5 = vcmp.lt.s32.totalorder %v435_v55, 4 }
 0x15f   : > { %v450_v23 = vor.u32 %v449_v16, %v448_v9  ;;  %v453_v24 = vor.u32 %v452_v18, %v451_v11  ;;  %v647_v34 = vshll.u32 %v1209_v0, %v644_v3  ;;  %v648_v40 = vshrl.u32 %v1210_v4, %v645_v22 }
 0x160   : > { %v458_v25 = vsel %vm454_vm2, %v438_v15, %v441_v19  ;;  %v459_v26 = vsel %vm457_vm5, %v447_v21, 2102212464  ;;  %v462_v27 = vsel %vm454_vm2, %v441_v19, %v444_v20  ;;  %v466_v28 = vsel %vm454_vm2, %v444_v20, %v447_v21 }
 0x161   : > { %v460_v29 = vsel %vm456_vm4, %v444_v20, %v459_v26  ;;  %v463_v30 = vsel %vm457_vm5, %v450_v23, 920167782  ;;  %v467_v33 = vsel %vm457_vm5, %v453_v24, 1326507024  ;;  %v650_v41 = vshll.u32 %v1210_v4, %v644_v3 }
 0x162   : > { %v464_v37 = vsel %vm456_vm4, %v447_v21, %v463_v30  ;;  %v468_v39 = vsel %vm456_vm4, %v450_v23, %v467_v33  ;;  %v461_v42 = vsel %vm455_vm3, %v458_v25, %v460_v29  ;;  %v651_v45 = vshrl.u32 %v1211_v6, %v645_v22 }
 0x163   : > { %v465_v43 = vsel %vm455_vm3, %v462_v27, %v464_v37  ;;  %v469_v44 = vsel %vm455_vm3, %v466_v28, %v468_v39  ;;  %v649_v50 = vor.u32 %v648_v40, %v647_v34  ;;  %v653_v53 = vshll.u32 %v1211_v6, %v644_v3 }
 0x164   : > { %v1459_v46 = vmul.u32.u64.low %v1424_v59, %v469_v44  ;;  %v1460_v47 = vmul.u32.u64.high %v1424_v59, %v469_v44, %v1459_v46  ;;  %v1463_v48 = vmul.u32.u64.low %v1424_v59, %v465_v43  ;;  %v1464_v49 = vmul.u32.u64.high %v1424_v59, %v465_v43, %v1463_v48 }
 0x165   : > { %v652_v51 = vor.u32 %v651_v45, %v650_v41  ;;  %v654_v54 = vshrl.u32 %v1212_v8, %v645_v22  ;;  %v646_v55 = vshrl.u32 %v1209_v0, %v645_v22  ;;  %v656_v56 = vshll.u32 %v1212_v8, %v644_v3 }
 0x166   : > { %v657_v57 = vshrl.u32 %v1213_v10, %v645_v22  ;;  %v660_v63 = vshrl.u32 %v1214_v17, %v645_v22  ;;  %v477_v1 = vmul.u32 %v1424_v59, %v461_v42  ;;  %v659_v7 = vshll.u32 %v1213_v10, %v644_v3 }
 0x167   : > { %v655_v5 = vor.u32 %v654_v54, %v653_v53  ;;  %vm662_vm7 = vcmp.lt.s32.totalorder %v1435_v2, 1  ;;  %vm479_vm8 = vc.u32 %v1460_v47, %v1463_v48  ;;  %v480_v9 = vadd.s32 1, %v1464_v49 }
 0x168   : > { %v658_v11 = vor.u32 %v657_v57, %v656_v56  ;;  %vm663_vm9 = vcmp.lt.s32.totalorder %v1435_v2, 2  ;;  %v661_v12 = vor.u32 %v660_v63, %v659_v7  ;;  %vm664_vm10 = vcmp.lt.s32.totalorder %v1435_v2, 3 }
 0x169   : > { %vm665_vm11 = vcmp.lt.s32.totalorder %v1435_v2, 4  ;;  %v670_v13 = vsel %vm662_vm7, %v649_v50, %v652_v51  ;;  %v481_v59 = vsel %vm479_vm8, %v480_v9, %v1464_v49  ;;  %v674_v15 = vsel %vm662_vm7, %v652_v51, %v655_v5 }
 0x16a   : > { %v667_v14 = vsel %vm665_vm11, %v655_v5, 2102212464  ;;  %v671_v3 = vsel %vm665_vm11, %v658_v11, 920167782  ;;  %v482_v16 = vadd.s32 %v481_v59, %v477_v1  ;;  %v666_v18 = vsel %vm662_vm7, %v646_v55, %v649_v50 }
 0x16b   : > { %v672_v19 = vsel %vm664_vm10, %v655_v5, %v671_v3  ;;  %v675_v20 = vsel %vm665_vm11, %v661_v12, 1326507024  ;;  %v668_v21 = vsel %vm664_vm10, %v652_v51, %v667_v14  ;;  %v330_v24 = vsel %vm329_vm6, %v1432_v62, 0 }
 0x16c   : > { %v673_v22 = vsel %vm663_vm9, %v670_v13, %v672_v19  ;;  %v676_v23 = vsel %vm664_vm10, %v658_v11, %v675_v20  ;;  %v483_v25 = vadd.s32 536870912, %v482_v16  ;;  %v669_v34 = vsel %vm663_vm9, %v666_v18, %v668_v21 }
 0x16d   : > { %v677_v26 = vsel %vm663_vm9, %v674_v15, %v676_v23  ;;  %v1491_v27 = vmul.u32.u64.low %v1426_v60, %v673_v22  ;;  %v1492_v28 = vmul.u32.u64.high %v1426_v60, %v673_v22, %v1491_v27  ;;  %v332_v37 = vand.u32 31, %v330_v24 }
 0x16e   : > { %v1496_v29 = vmul.u32.u64.low %v1426_v60, %v677_v26  ;;  %v1497_v30 = vmul.u32.u64.high %v1426_v60, %v677_v26, %v1496_v29  ;;  %v484_v33 = vshrl.u32 %v483_v25, 30  ;;  %v326_v62 = vor.u32 8388608, %v1430_v61 }
 0x16f   : > { %v526_v39 = vand.u32 2147483647, %v1422_v58  ;;  %v688_v41 = vadd.s32 1, %v1492_v28  ;;  %v333_v42 = vsub.s32 32, %v332_v37  ;;  %v529_v43 = vand.u32 2139095040, %v1422_v58 }
 0x170   : > { %v485_v40 = vshll.u32 %v484_v33, 30  ;;  %v685_v44 = vmul.u32 %v1426_v60, %v669_v34  ;;  %vm687_vm12 = vc.u32 %v1497_v30, %v1491_v27  ;;  %v1513_v49 = vshll.u32 %v326_v62, 8 }
 0x171   : > { %v689_v2 = vsel %vm687_vm12, %v688_v41, %v1492_v28  ;;  %v336_v46 = vshrl.u32 %v1210_v4, %v333_v42  ;;  %v1517_v50 = vand.u32 8388607, %v526_v39  ;;  %v339_v51 = vshrl.u32 %v1211_v6, %v333_v42 }
 0x172   : > { %v1508_v45 = vsub.s32 %v482_v16, %v485_v40  ;;  %v690_v61 = vadd.s32 %v689_v2, %v685_v44  ;;  %v342_v53 = vshrl.u32 %v1212_v8, %v333_v42  ;;  %v530_v54 = vshrl.u32 %v529_v43, 23 }
 0x173   : > { %v508_v55 = vsub.s32 4, %v484_v33  ;;  %v1522_v57 = vshrl.u32 %v330_v24, 5  ;;  %v335_v63 = vshll.u32 %v1209_v0, %v332_v37  ;;  %v338_v5 = vshll.u32 %v1210_v4, %v332_v37 }
 0x174   : > { %v488_v60 = vsub.s32 0, %v1508_v45  ;;  %v691_v56 = vadd.s32 536870912, %v690_v61  ;;  %v341_v7 = vshll.u32 %v1211_v6, %v332_v37  ;;  %v345_v9 = vshrl.u32 %v1213_v10, %v333_v42 }
 0x175   : > { %v337_v12 = vor.u32 %v336_v46, %v335_v63  ;;  %v344_v13 = vshll.u32 %v1212_v8, %v332_v37  ;;  %v348_v59 = vshrl.u32 %v1214_v17, %v333_v42  ;;  %v340_v15 = vor.u32 %v339_v51, %v338_v5 }
 0x176   : > { %v852_v1 = vmin.u32 %v488_v60, %v1508_v45  ;;  %v1529_v11 = vshrl.u32 %v691_v56, 30  ;;  %v343_v16 = vor.u32 %v342_v53, %v341_v7  ;;  %v347_v18 = vshll.u32 %v1213_v10, %v332_v37 }
 0x177   : > { %v478_v19 = vadd.s32 %v1463_v48, %v1460_v47  ;;  %v346_v21 = vor.u32 %v345_v9, %v344_v13  ;;  %v855_v22 = vadd.s32 4294967169, %v530_v54  ;;  %vm350_vm15 = vcmp.lt.s32.totalorder %v1522_v57, 1 }
 0x178   : > { %v490_v3 = vclz %v852_v1  ;;  %v693_v20 = vshll.u32 %v1529_v11, 30  ;;  %v349_v24 = vor.u32 %v348_v59, %v347_v18  ;;  %vm353_vm0 = vcmp.lt.s32.totalorder %v1522_v57, 4 }
 0x179   : > { %vm351_vm1 = vcmp.lt.s32.totalorder %v1522_v57, 2  ;;  %vm352_vm2 = vcmp.lt.s32.totalorder %v1522_v57, 3  ;;  %v359_v25 = vsel %vm353_vm0, %v346_v21, 920167782  ;;  %v509_v47 = vsel %vm424_vm13, %v508_v55, %v484_v33 }
 0x17a   : > { %v853_v23 = vadd.s32 4294967294, %v490_v3  ;;  %v1545_v36 = vsub.s32 %v690_v61, %v693_v20  ;;  %v358_v48 = vsel %vm350_vm15, %v337_v12, %v340_v15  ;;  %v360_v26 = vsel %vm352_vm2, %v343_v16, %v359_v25 }
 0x17b   : > { %v334_v34 = vshrl.u32 %v1209_v0, %v333_v42  ;;  %v362_v37 = vsel %vm350_vm15, %v340_v15, %v343_v16  ;;  %v355_v41 = vsel %vm353_vm0, %v343_v16, 2102212464  ;;  %v363_v33 = vsel %vm353_vm0, %v349_v24, 1326507024 }
 0x17c   : > { %vm854_vm3 = vcmp.lt.s32.totalorder %v853_v23, 0  ;;  %v696_v29 = vsub.s32 0, %v1545_v36  ;;  %v361_v2 = vsel %vm351_vm1, %v358_v48, %v360_v26  ;;  %v364_v42 = vsel %vm352_vm2, %v346_v21, %v363_v33 }
 0x17d   : > { %v493_v28 = vsel %vm854_vm3, 0, %v853_v23  ;;  %v365_v60 = vsel %vm351_vm1, %v362_v37, %v364_v42  ;;  %v536_v51 = vadd.s32 1, %v855_v22  ;;  %v511_v53 = vsel %vm1535_vm14, 0, %v509_v47 }
 0x17e   : > { %v494_v62 = vsub.s32 32, %v493_v28  ;;  %v498_v40 = vsub.s32 4294967266, %v493_v28  ;;  %v495_v43 = vshll.u32 %v1508_v45, %v493_v28  ;;  %v860_v44 = vmin.u32 %v696_v29, %v1545_v36 }
 0x17f   : > { %v354_v45 = vsel %vm350_vm15, %v334_v34, %v337_v12  ;;  %v356_v55 = vsel %vm352_vm2, %v340_v15, %v355_v41  ;;  %v1580_v1 = vmul.u32.u64.low %v1513_v49, %v365_v60  ;;  %v1581_v5 = vmul.u32.u64.high %v1513_v49, %v365_v60, %v1580_v1 }
 0x180   : > { %v496_v61 = vshrl.u32 %v478_v19, %v494_v62  ;;  %v499_v46 = vadd.s32 127, %v498_v40  ;;  %v698_v54 = vclz %v860_v44  ;;  %vm537_vm4 = vcmp.gt.s32.totalorder %v536_v51, 0 }
 0x181   : > { %v1584_v9 = vmul.u32.u64.low %v1513_v49, %v361_v2  ;;  %v1585_v13 = vmul.u32.u64.high %v1513_v49, %v361_v2, %v1584_v9  ;;  %v686_v12 = vadd.s32 %v1491_v27, %v1497_v30  ;;  %v534_v3 = vor.u32 8388608, %v1517_v50 }
 0x182   : > { %v497_v56 = vor.u32 %v496_v61, %v495_v43  ;;  %v500_v63 = vshll.u32 %v499_v46, 23  ;;  %v861_v7 = vadd.s32 4294967294, %v698_v54  ;;  %v538_v15 = vsel %vm537_vm4, %v536_v51, 0 }
 0x183   : > { %v515_v16 = vadd.s32 3, %v511_v53  ;;  %v357_v18 = vsel %vm351_vm1, %v354_v45, %v356_v55  ;;  %v540_v19 = vand.u32 31, %v538_v15  ;;  %vm375_vm6 = vc.u32 %v1581_v5, %v1584_v9 }
 0x184   : > { %v501_v59 = vor.u32 4788187, %v500_v63  ;;  %vm862_vm5 = vcmp.lt.s32.totalorder %v861_v7, 0  ;;  %v504_v21 = vcvt.s32.f32 %v497_v56  ;;  %v716_v25 = vsub.s32 4, %v1529_v11 }
 0x185   : > { %v701_v22 = vsel %vm862_vm5, 0, %v861_v7  ;;  %v376_v27 = vadd.s32 1, %v1585_v13  ;;  %v373_v50 = vmul.u32 %v1513_v49, %v357_v18  ;;  %v1598_v47 = vshrl.u32 %v538_v15, 5 }
 0x186   : > { %v502_v20 = vand.u32 2147483647, %v501_v59  ;;  %v702_v23 = vsub.s32 32, %v701_v22  ;;  %v706_v24 = vsub.s32 4294967266, %v701_v22  ;;  %v541_v57 = vsub.s32 32, %v540_v19 }
 0x187   : > { %v703_v48 = vshll.u32 %v1545_v36, %v701_v22  ;;  %v377_v29 = vsel %vm375_vm6, %v376_v27, %v1585_v13  ;;  %v543_v62 = vshll.u32 %v1209_v0, %v540_v19  ;;  %v546_v43 = vshll.u32 %v1210_v4, %v540_v19 }
 0x188   : > { %v505_v30 = vmul.f32 %v504_v21, %v502_v20  ;;  %v704_v26 = vshrl.u32 %v686_v12, %v702_v23  ;;  %v707_v28 = vadd.s32 127, %v706_v24  ;;  %v378_v37 = vadd.s32 %v377_v29, %v373_v50 }
 0x189   : > { %v544_v40 = vshrl.u32 %v1210_v4, %v541_v57  ;;  %v547_v49 = vshrl.u32 %v1211_v6, %v541_v57  ;;  %v549_v2 = vshll.u32 %v1211_v6, %v540_v19  ;;  %v550_v42 = vshrl.u32 %v1212_v8, %v541_v57 }
 0x18a   : > { %v506_v34 = vxor.u32 2147483648, %v505_v30  ;;  %v705_v41 = vor.u32 %v704_v26, %v703_v48  ;;  %v708_v33 = vshll.u32 %v707_v28, 23  ;;  %v379_v36 = vadd.s32 536870912, %v378_v37 }
 0x18b   : > { %v545_v60 = vor.u32 %v544_v40, %v543_v62  ;;  %v552_v51 = vshll.u32 %v1212_v8, %v540_v19  ;;  %v553_v54 = vshrl.u32 %v1213_v10, %v541_v57  ;;  %v548_v55 = vor.u32 %v547_v49, %v546_v43 }
 0x18c   : > { %v507_v44 = vsel %vm424_vm13, %v506_v34, %v505_v30  ;;  %v709_v46 = vor.u32 4788187, %v708_v33  ;;  %v712_v4 = vcvt.s32.f32 %v705_v41  ;;  %v1614_v53 = vshrl.u32 %v379_v36, 30 }
 0x18d   : > { %v510_v61 = vsel %vm1535_vm14, %v1406_v31, %v507_v44  ;;  %v556_v6 = vshrl.u32 %v1214_v17, %v541_v57  ;;  %v516_v56 = vand.u32 3, %v515_v16  ;;  %vm632_vm7 = vcmp.lt.s32.totalorder %v1408_v32, 0 }
 0x18e   : > { %1059 = vcosq.f32 %v510_v61  ;;  %v710_v45 = vand.u32 2147483647, %v709_v46  ;;  %v381_v14 = vshll.u32 %v1614_v53, 30  ;;  %v554_v63 = vor.u32 %v553_v54, %v552_v51 }
 0x18f   : > { %1061 = vsinq.f32 %v510_v61  ;;  %vm1622_vm8 = vcmp.le.f32.partialorder %v630_v38, 0.7853982  ;;  %v551_v7 = vor.u32 %v550_v42, %v549_v2  ;;  %v555_v13 = vshll.u32 %v1213_v10, %v540_v19 }
 0x190   : > { %v713_v1 = vmul.f32 %v712_v4, %v710_v45  ;;  %v717_v17 = vsel %vm632_vm7, %v716_v25, %v1529_v11  ;;  %v1630_v59 = vsub.s32 %v378_v37, %v381_v14  ;;  %vm558_vm9 = vcmp.lt.s32.totalorder %v1598_v47, 1 }
 0x191   : > { %v574_v12 = vshll.u32 %v534_v3, 8  ;;  %v557_v16 = vor.u32 %v556_v6, %v555_v13  ;;  %vm561_vm10 = vcmp.lt.s32.totalorder %v1598_v47, 4  ;;  %v566_v38 = vsel %vm558_vm9, %v545_v60, %v548_v55 }
 0x192   : > { %v714_v15 = vxor.u32 2147483648, %v713_v1  ;;  %vm517_vm11 = vcmp.lt.s32.totalorder %v516_v56, 2  ;;  %v384_v18 = vsub.s32 0, %v1630_v59  ;;  %v542_v10 = vshrl.u32 %v1209_v0, %v541_v57 }
 0x193   : > { %vm560_vm12 = vcmp.lt.s32.totalorder %v1598_v47, 3  ;;  %v567_v11 = vsel %vm561_vm10, %v554_v63, 920167782  ;;  %vm559_vm13 = vcmp.lt.s32.totalorder %v1598_v47, 2  ;;  %v563_v19 = vsel %vm561_vm10, %v551_v7, 2102212464 }
 0x194   : > { %v715_v3 = vsel %vm632_vm7, %v714_v15, %v713_v1  ;;  %v568_v20 = vsel %vm560_vm12, %v551_v7, %v567_v11  ;;  %v848_v21 = vmin.u32 %v384_v18, %v1630_v59  ;;  %v570_v23 = vsel %vm558_vm9, %v548_v55, %v551_v7 }
 0x195   : > { %v718_v0 = vsel %vm1622_vm8, %v1408_v32, %v715_v3  ;;  %v569_v22 = vsel %vm559_vm13, %v566_v38, %v568_v20  ;;  %v571_v24 = vsel %vm561_vm10, %v557_v16, 1326507024  ;;  %vm518_vm14 = vcmp.eq.s32.totalorder %v516_v56, 0 }
 0x196   : > { %1063 = vcosq.f32 %v718_v0  ;;  %v1658_v25 = vmul.u32.u64.low %v574_v12, %v569_v22  ;;  %v1659_v27 = vmul.u32.u64.high %v574_v12, %v569_v22, %v1658_v25  ;;  %v719_v50 = vsel %vm1622_vm8, 0, %v717_v17 }
 0x197   : > { %1065 = vsinq.f32 %v718_v0  ;;  %v386_v57 = vclz %v848_v21  ;;  %v562_v28 = vsel %vm558_vm9, %v542_v10, %v545_v60  ;;  %v564_v29 = vsel %vm560_vm12, %v548_v55, %v563_v19 }
 0x198   : > { %v1060_v30 = vpop.eup %1059  ;;  %v572_v34 = vsel %vm560_vm12, %v554_v63, %v571_v24  ;;  %vm521_vm15 = vcmp.eq.s32.totalorder %v516_v56, 2  ;;  %v723_v33 = vadd.s32 3, %v719_v50  ;;  %v565_v36 = vsel %vm559_vm13, %v562_v28, %v564_v29 }
 0x199   : > { %v1062_v48 = vpop.eup %1061  ;;  %v522_v26 = vxor.u32 2147483648, %v1060_v30  ;;  %v849_v62 = vadd.s32 4294967294, %v386_v57  ;;  %v573_v40 = vsel %vm559_vm13, %v570_v23, %v572_v34  ;;  %v584_v2 = vadd.s32 1, %v1659_v27 }
 0x19a   : > { %v519_v37 = vxor.u32 2147483648, %v1062_v48  ;;  %v1672_v43 = vmul.u32.u64.low %v574_v12, %v573_v40  ;;  %v1673_v49 = vmul.u32.u64.high %v574_v12, %v573_v40, %v1672_v43  ;;  %vm514_vm1 = vweird.f32 %v1406_v31 }
 0x19b   : > { %v523_v41 = vsel %vm521_vm15, %v522_v26, %v1062_v48  ;;  %vm850_vm0 = vcmp.lt.s32.totalorder %v849_v62, 0  ;;  %v374_v60 = vadd.s32 %v1584_v9, %v1581_v5  ;;  %v724_v47 = vand.u32 3, %v723_v33 }
 0x19c   : > { %v520_v44 = vsel %vm518_vm14, %v1060_v30, %v519_v37  ;;  %v389_v61 = vsel %vm850_vm0, 0, %v849_v62  ;;  %v581_v54 = vmul.u32 %v574_v12, %v565_v36  ;;  %vm583_vm2 = vc.u32 %v1673_v49, %v1658_v25 }
 0x19d   : > { %v524_v42 = vsel %vm517_vm11, %v520_v44, %v523_v41  ;;  %v390_v51 = vsub.s32 32, %v389_v61  ;;  %v394_v4 = vsub.s32 4294967266, %v389_v61  ;;  %v391_v31 = vshll.u32 %v1630_v59, %v389_v61 }
 0x19e   : > { %v525_v46 = vsel %vm514_vm1, nan, %v524_v42  ;;  %v585_v6 = vsel %vm583_vm2, %v584_v2, %v1659_v27  ;;  %vm729_vm3 = vcmp.eq.s32.totalorder %v724_v47, 2  ;;  %vm726_vm4 = vcmp.eq.s32.totalorder %v724_v47, 0 }
 0x19f   : > { %735 = vst [vmem:[%s1685_s8 + $0x8] sm:$0xff] %v525_v46  ;;  %v392_v45 = vshrl.u32 %v374_v60, %v390_v51  ;;  %v395_v55 = vadd.s32 127, %v394_v4  ;;  %v586_v5 = vadd.s32 %v585_v6, %v581_v54  ;;  %vm725_vm5 = vcmp.lt.s32.totalorder %v724_v47, 2 }
 0x1a0   : > { %v1064_v56 = vpop.eup %1063  ;;  %vm722_vm6 = vweird.f32 %v1408_v32  ;;  %v404_v3 = vsub.s32 4, %v1614_v53  ;;  %vm320_vm7 = vcmp.lt.s32.totalorder %v1410_v35, 0  ;;  %vm319_vm8 = vcmp.le.f32.partialorder %v318_v52, 0.7853982 }
 0x1a1   : > { %v1066_v9 = vpop.eup %1065  ;;  %v730_v14 = vxor.u32 2147483648, %v1064_v56  ;;  %v393_v63 = vor.u32 %v392_v45, %v391_v31  ;;  %v396_v8 = vshll.u32 %v395_v55, 23  ;;  %v587_v7 = vadd.s32 536870912, %v586_v5 }
 0x1a2   : > { %v727_v1 = vxor.u32 2147483648, %v1066_v9  ;;  %v405_v32 = vsel %vm320_vm7, %v404_v3, %v1614_v53  ;;  %v582_v48 = vadd.s32 %v1658_v25, %v1673_v49  ;;  %vm410_vm13 = vweird.f32 %v1410_v35 }
 0x1a3   : > { %v731_v13 = vsel %vm729_vm3, %v730_v14, %v1066_v9  ;;  %v397_v17 = vor.u32 4788187, %v396_v8  ;;  %v588_v59 = vshrl.u32 %v587_v7, 30  ;;  %v400_v38 = vcvt.s32.f32 %v393_v63 }
 0x1a4   : > { %v728_v12 = vsel %vm726_vm4, %v1064_v56, %v727_v1  ;;  %v407_v24 = vsel %vm319_vm8, 0, %v405_v32  ;;  %vm528_vm14 = vcmp.lt.s32.totalorder %v1422_v58, 0  ;;  %vm527_vm15 = vcmp.le.f32.partialorder %v526_v39, 0.7853982 }
 0x1a5   : > { %v732_v15 = vsel %vm725_vm5, %v728_v12, %v731_v13  ;;  %v398_v16 = vand.u32 2147483647, %v397_v17  ;;  %v589_v10 = vshll.u32 %v588_v59, 30  ;;  %v411_v50 = vadd.s32 3, %v407_v24 }
 0x1a6   : > { %v733_v18 = vsel %vm722_vm6, nan, %v732_v15  ;;  %v612_v60 = vsub.s32 4, %v588_v59  ;;  %vm618_vm3 = vweird.f32 %v1422_v58 }
 0x1a7   : > { %737 = vst [vmem:[%s1685_s8 + $0x18] sm:$0xff] %v733_v18  ;;  %v401_v11 = vmul.f32 %v400_v38, %v398_v16  ;;  %v590_v19 = vsub.s32 %v586_v5, %v589_v10  ;;  %v412_v52 = vand.u32 3, %v411_v50 }
 0x1a8   : > { %v613_v47 = vsel %vm528_vm14, %v612_v60, %v588_v59 }
 0x1a9   : > { %v402_v20 = vxor.u32 2147483648, %v401_v11  ;;  %v592_v0 = vsub.s32 0, %v590_v19  ;;  %vm417_vm10 = vcmp.eq.s32.totalorder %v412_v52, 2  ;;  %vm414_vm11 = vcmp.eq.s32.totalorder %v412_v52, 0 }
 0x1aa   : > { %vm413_vm12 = vcmp.lt.s32.totalorder %v412_v52, 2 }
 0x1ab   : > { %v403_v21 = vsel %vm320_vm7, %v402_v20, %v401_v11  ;;  %v856_v23 = vmin.u32 %v592_v0, %v590_v19 }
 0x1ac   : > { %v406_v22 = vsel %vm319_vm8, %v1410_v35, %v403_v21  ;;  %v615_v35 = vsel %vm527_vm15, 0, %v613_v47 }
 0x1ad   : > { %1067 = vcosq.f32 %v406_v22  ;;  %v594_v27 = vclz %v856_v23  ;;  %v619_v31 = vadd.s32 3, %v615_v35 }
 0x1ae   : > { %1069 = vsinq.f32 %v406_v22 }
 0x1af   : > { %v857_v30 = vadd.s32 4294967294, %v594_v27  ;;  %v620_v45 = vand.u32 3, %v619_v31 }
 0x1b1   : > { %vm858_vm9 = vcmp.lt.s32.totalorder %v857_v30, 0  ;;  %vm625_vm0 = vcmp.eq.s32.totalorder %v620_v45, 2  ;;  %vm622_vm1 = vcmp.eq.s32.totalorder %v620_v45, 0  ;;  %vm621_vm2 = vcmp.lt.s32.totalorder %v620_v45, 2 }
 0x1b2   : > { %v597_v57 = vsel %vm858_vm9, 0, %v857_v30 }
 0x1b3   : > { %v598_v26 = vsub.s32 32, %v597_v57  ;;  %v602_v28 = vsub.s32 4294967266, %v597_v57  ;;  %v599_v29 = vshll.u32 %v590_v19, %v597_v57 }
 0x1b5   : > { %v600_v34 = vshrl.u32 %v582_v48, %v598_v26  ;;  %v603_v53 = vadd.s32 127, %v602_v28 }
 0x1b7   : > { %v1068_v37 = vpop.eup %1067  ;;  %v601_v41 = vor.u32 %v600_v34, %v599_v29  ;;  %v604_v33 = vshll.u32 %v603_v53, 23 }
 0x1b8   : > { %v1070_v62 = vpop.eup %1069  ;;  %v418_v40 = vxor.u32 2147483648, %v1068_v37 }
 0x1b9   : > { %v415_v43 = vxor.u32 2147483648, %v1070_v62  ;;  %v605_v36 = vor.u32 4788187, %v604_v33  ;;  %v608_v42 = vcvt.s32.f32 %v601_v41 }
 0x1ba   : > { %v419_v44 = vsel %vm417_vm10, %v418_v40, %v1070_v62 }
 0x1bb   : > { %v416_v2 = vsel %vm414_vm11, %v1068_v37, %v415_v43  ;;  %v606_v49 = vand.u32 2147483647, %v605_v36 }
 0x1bc   : > { %v420_v25 = vsel %vm413_vm12, %v416_v2, %v419_v44 }
 0x1bd   : > { %v421_v61 = vsel %vm410_vm13, nan, %v420_v25  ;;  %v609_v46 = vmul.f32 %v608_v42, %v606_v49 }
 0x1be   : > { %734 = vst [vmem:[%s1685_s8] sm:$0xff] %v421_v61 }
 0x1bf   : > { %v610_v51 = vxor.u32 2147483648, %v609_v46 }
 0x1c1   : > { %v611_v4 = vsel %vm528_vm14, %v610_v51, %v609_v46 }
 0x1c2   : > { %v614_v54 = vsel %vm527_vm15, %v1422_v58, %v611_v4 }
 0x1c3   : > { %1071 = vcosq.f32 %v614_v54 }
 0x1c4   : > { %1073 = vsinq.f32 %v614_v54 }
 0x1cd   : > { %v1072_v55 = vpop.eup %1071 }
 0x1ce   : > { %v1074_v6 = vpop.eup %1073  ;;  %v626_v56 = vxor.u32 2147483648, %v1072_v55 }
 0x1cf   : > { %v623_v5 = vxor.u32 2147483648, %v1074_v6 }
 0x1d0   : > { %v627_v39 = vsel %vm625_vm0, %v626_v56, %v1074_v6 }
 0x1d1   : > { %v624_v9 = vsel %vm622_vm1, %v1072_v55, %v623_v5 }
 0x1d2   : > { %v628_v14 = vsel %vm621_vm2, %v624_v9, %v627_v39 }
 0x1d3   : > { %v629_v63 = vsel %vm618_vm3, nan, %v628_v14 }
 0x1d4   : > { %736 = vst [vmem:[%s1685_s8 + $0x10] sm:$0xff] %v629_v63 }
 0x1d5   : > { %1146 = shalt.err (!%p1143_p7)
}
 0x1d6   : > { %s1147_s30 = scalar_lea.hbm %s1713_s11, 512  ;;  %s1151_s10 = scalar_lea.hbm %s1764_s3, 1024 }
 0x1d7   : > { %p1148_p9 = scmp.ne.s32.totalorder %s1713_s11, %s1147_s30  ;;  %p1152_p5 = scmp.lt.u32.totalorder %s1713_s11, %s1764_s3 }
 0x1d8   : > { %p1153_p11 = scmp.lt.u32.totalorder %s1151_s10, %s1147_s30  ;;  %p1155_p4 = scmp.lt.u32.totalorder %s1147_s30, %s1713_s11 }
 0x1d9   : > { %p1149_p1 = pnand %p1148_p9, %p1332_p12 }
 0x1da   : > { %p1154_p2 = por %p1153_p11, %p1152_p5 }
 0x1db   : > { %p1150_p0 = pneg %p1149_p1 }
 0x1dc   : > { %p1156_p6 = por %p1155_p4, %p1154_p2 }
 0x1de   : > { %p1157_p8 = pnand %p1156_p6, %p1150_p0 }
 0x1e0   : > { %1160 = shalt.err (!%p1157_p8)
}
 0x1e1   : > { %s1216_s20 = smov 128   ;;  %s1217_s8 = smov 8  }
 0x1e2   : > { %998 = dma.vmem_to_hbm [thread:$0]  (%p1332_p12), %s1715_s4, 512, %s1713_s11, %s739_s16, %s1216_s20, %s1216_s20, %s1217_s8  }
 0x1e3 PF: > { %s767_s9 = sand.u32 1, %s1191_s12   ;;  %p1783_p10 = scmp.ne.s32.totalorder %s1769_s19, 0 }
 0x1e4   : > { %p1784_p13 = scmp.ge.s32.totalorder %s1203_s15, 2  ;;  %s768_s25 = scalar_lea.sflag [#allocation4], %s767_s9 }
 0x1e6   : > { %p1009_p3 = pnand %p1784_p13, %p1783_p10 }
 0x1e8   : > { %1186 = dma.done.wait (!%p1009_p3), %s768_s25, 512  }
 0x1e9   : > { %1188 = vsyncadd (!%p1009_p3), %s768_s25, 4294966784  ;;  %p17_p7 = scmp.ge.s32.totalorder %s1294_s24, 4   ;;  %s1785_s12 = smov %s1195_s13 }
 0x1ea   : > { %s1786_s13 = smov %s1199_s14  ;;  %s1787_s14 = smov %s1328_s17 }
 0x1eb   : > { %s1788_s15 = smov %s1294_s24  ;;  %19 = sbr.rel (!%p17_p7) target bundleno = 6 (0x6), region = 81 }
 0x1f2   :  { %773 = vsyncpa [#allocation3], 1 }
 0x1f3   :  { %775 = vsyncpa [#allocation3 + $0x1], 1 }
 0x1f4   :  { %776 = vsyncpa [#allocation6], 1 }
 0x1f5   :  { %777 = vsyncpa [#allocation4], 1 }
 0x1f6   :  { %779 = vsyncpa [#allocation4 + $0x1], 1 }

</bundles_post_ra>
